<compile_context>
chip_gen: v7x
topology: tpu7x:2x2x1
jax: 0.10.0
libtpu: 0.0.40
codegen_flags: <defaults>
</compile_context>

<pallas_src>
import functools

import jax
import jax.numpy as jnp
from jax import lax
from jax.experimental import pallas as pl
from jax.experimental.pallas import tpu as pltpu


GEM_P = 3.0          # GeM default p
GEM_EPS = 1e-6       # GeM default eps
L2_EPS = 1e-12       # torch.nn.functional.normalize default eps


def _geoloc_kernel(patches_ref, w9_ref, cb_ref, fcw_ref, fcb_ref,
                   out_ref, gem_ref, *, gem_p, gem_eps, l2_eps):
    """Grid axis = batch.  Each step: im2col conv + ReLU + channel L2Norm +
    GeM mean-of-cubes for one image (stashed in VMEM scratch).  Last step:
    batched cube root + Linear + final L2Norm, single lane-dense (B, Fp) store."""
    b = pl.program_id(0)

    # ---- backbone stand-in: one im2col matmul (bf16 operands, f32 acc) ----
    feat = jnp.dot(patches_ref[0], w9_ref[...],
                   preferred_element_type=jnp.float32)            # (HW, Cp)
    feat = jnp.maximum(feat + cb_ref[...], 0.0)                   # bias + ReLU

    # ---- L2Norm over channels (lane reduce; rsqrt runs on the EUP) ----
    sumsq = jnp.sum(feat * feat, axis=-1, keepdims=True)          # (HW, 1)
    feat = feat * lax.rsqrt(jnp.maximum(sumsq, l2_eps * l2_eps))

    # ---- GeM pooling body: clamp, explicit cube (VPU), spatial mean ----
    # The 1/3 root is deferred to the final batched step (one EUP pass total).
    xm = jnp.maximum(feat, gem_eps)
    gem_ref[pl.ds(b, 1), :] = jnp.mean(xm * xm * xm, axis=0, keepdims=True)

    # ---- last step: batched GeM root + Flatten + Linear + final L2Norm ----
    @pl.when(b == pl.num_programs(0) - 1)
    def _():
        gmat = gem_ref[...] ** (1.0 / gem_p)                      # (B, Cp), >0
        y = jnp.dot(gmat.astype(fcw_ref.dtype), fcw_ref[...],
                    preferred_element_type=jnp.float32) + fcb_ref[...]
        ysq = jnp.sum(y * y, axis=-1, keepdims=True)              # (B, 1)
        out_ref[...] = y * lax.rsqrt(jnp.maximum(ysq, l2_eps * l2_eps))


def _pad_to(x, axis, size):
    pad = [(0, 0)] * x.ndim
    pad[axis] = (0, size - x.shape[axis])
    return jnp.pad(x, pad)


def geolocalization_net(image_nchw, conv_w, conv_b, fc_w, fc_b):
    """image_nchw: (B, Cin, H, W) f32 -> (B, fc_output_dim) f32."""
    B, Cin, H, W = image_nchw.shape
    Cfeat = conv_w.shape[-1]
    F = fc_w.shape[-1]
    HW = H * W
    K = 9 * Cin
    Cp = ((Cfeat + 127) // 128) * 128      # lane-pad feature channels
    Fp = ((F + 127) // 128) * 128          # lane-pad descriptor dim

    # ---- glue (plain JAX): NCHW -> NHWC, halo pad, im2col patches ----
    # TODO(synk): at real CosPlace image sizes fold im2col / the halo into the
    #             kernel (index_map over-read + masking) to avoid the 9x HBM
    #             blow-up; negligible at these toy shapes.
    x = jnp.transpose(image_nchw, (0, 2, 3, 1)).astype(jnp.float32)
    xp = jnp.pad(x, ((0, 0), (1, 1), (1, 1), (0, 0)))
    patches = jnp.stack(
        [xp[:, dy:dy + H, dx:dx + W, :] for dy in range(3) for dx in range(3)],
        axis=3)                                                   # (B,H,W,9,Cin)
    patches = patches.reshape(B, HW, K).astype(jnp.bfloat16)

    # Weights: reshape conv to (9*Cin, Cfeat), zero-pad channels, bf16 operands.
    w9 = _pad_to(conv_w.reshape(K, Cfeat).astype(jnp.float32), 1, Cp)
    w9 = w9.astype(jnp.bfloat16)
    cb = _pad_to(conv_b.reshape(1, Cfeat).astype(jnp.float32), 1, Cp)
    fcw = _pad_to(_pad_to(fc_w.astype(jnp.float32), 0, Cp), 1, Fp)
    fcw = fcw.astype(jnp.bfloat16)
    fcb = _pad_to(fc_b.reshape(1, F).astype(jnp.float32), 1, Fp)

    kernel = functools.partial(_geoloc_kernel, gem_p=GEM_P, gem_eps=GEM_EPS,
                               l2_eps=L2_EPS)

    out = pl.pallas_call(
        kernel,
        out_shape=jax.ShapeDtypeStruct((B, Fp), jnp.float32),
        grid_spec=pltpu.PrefetchScalarGridSpec(
            num_scalar_prefetch=0,
            grid=(B,),
            in_specs=[
                pl.BlockSpec((1, HW, K), lambda b: (b, 0, 0)),   # patches (streamed)
                pl.BlockSpec((K, Cp), lambda b: (0, 0)),         # conv weights (resident)
                pl.BlockSpec((1, Cp), lambda b: (0, 0)),         # conv bias (resident)
                pl.BlockSpec((Cp, Fp), lambda b: (0, 0)),        # fc weights (resident)
                pl.BlockSpec((1, Fp), lambda b: (0, 0)),         # fc bias (resident)
            ],
            # Output resident across the grid; written once on the last step.
            out_specs=pl.BlockSpec((B, Fp), lambda b: (0, 0)),
            scratch_shapes=[pltpu.VMEM((B, Cp), jnp.float32)],   # GeM stats
        ),
        compiler_params=pltpu.CompilerParams(
            # Scratch + resident output carry state across the batch axis.
            dimension_semantics=("arbitrary",)),
    )(patches, w9, cb, fcw, fcb)

    return out[:, :F]


def _reference(image_nchw, conv_w, conv_b, fc_w, fc_b):
    """Pure-JAX f32 reference for sanity checking."""
    x = jnp.transpose(image_nchw, (0, 2, 3, 1))
    feat = lax.conv_general_dilated(
        x, conv_w, window_strides=(1, 1), padding="SAME",
        dimension_numbers=("NHWC", "HWIO", "NHWC"))
    feat = jnp.maximum(feat + conv_b, 0.0)                        # (B, H, W, C)
    norm = jnp.sqrt(jnp.sum(feat * feat, axis=-1, keepdims=True))
    feat = feat / jnp.maximum(norm, L2_EPS)
    g = jnp.mean(jnp.maximum(feat, GEM_EPS) ** GEM_P, axis=(1, 2)) ** (1.0 / GEM_P)
    y = g @ fc_w + fc_b
    yn = jnp.sqrt(jnp.sum(y * y, axis=-1, keepdims=True))
    return y / jnp.maximum(yn, L2_EPS)


if __name__ == "__main__":
    # Small, deterministic shapes consistent with the module's forward pass.
    B, Cin, H, W = 2, 3, 16, 16      # input image (NCHW)
    Cfeat = 32                       # stand-in for CHANNELS_NUM_IN_LAST_CONV[backbone]
    F = 16                           # fc_output_dim

    key = jax.random.PRNGKey(0)
    k_img, k_cw, k_cb, k_fw, k_fb = jax.random.split(key, 5)

    image = jax.random.normal(k_img, (B, Cin, H, W), jnp.float32)
    conv_w = 0.1 * jax.random.normal(k_cw, (3, 3, Cin, Cfeat), jnp.float32)  # HWIO
    conv_b = 0.1 * jax.random.normal(k_cb, (Cfeat,), jnp.float32)
    # nn.Linear(features_dim, fc_output_dim): stored here already transposed (in, out).
    fc_w = 0.1 * jax.random.normal(k_fw, (Cfeat, F), jnp.float32)
    fc_b = 0.1 * jax.random.normal(k_fb, (F,), jnp.float32)

    out = geolocalization_net(image, conv_w, conv_b, fc_w, fc_b)
    out = jax.block_until_ready(out)

    ref = _reference(image, conv_w, conv_b, fc_w, fc_b)
    assert out.shape == (B, F), out.shape
    # bf16 MXU operands (f32 accumulation) -> slightly looser tolerance.
    assert jnp.allclose(out, ref, rtol=2e-2, atol=2e-2), (
        f"max abs err {jnp.max(jnp.abs(out - ref))}")

    print("KERNEL_OK")
</pallas_src>

<mosaic_0001>
module attributes {stable_mosaic.version = 11 : i64} {
  func.func @_geoloc_kernel(%arg0: i32, %arg1: memref<1x256x27xbf16, #tpu.memory_space<vmem>>, %arg2: memref<27x128xbf16, #tpu.memory_space<vmem>>, %arg3: memref<1x128xf32, #tpu.memory_space<vmem>>, %arg4: memref<128x128xbf16, #tpu.memory_space<vmem>>, %arg5: memref<1x128xf32, #tpu.memory_space<vmem>>, %arg6: memref<2x128xf32, #tpu.memory_space<vmem>>, %arg7: memref<2x128xf32, #tpu.memory_space<vmem>>) attributes {dimension_semantics = [#tpu.dimension_semantics<arbitrary>], iteration_bounds = array<i64: 2>, scalar_prefetch = 0 : i64, scratch_operands = 1 : i64, tpu.core_type = #tpu.core_type<tc>, window_params = [{transform_indices = @transform_0, window_bounds = array<i64: 1, 256, 27>}, {pipeline_mode = #tpu.pipeline_mode<synchronous>, transform_indices = @transform_1, window_bounds = array<i64: 27, 128>}, {pipeline_mode = #tpu.pipeline_mode<synchronous>, transform_indices = @transform_2, window_bounds = array<i64: 1, 128>}, {pipeline_mode = #tpu.pipeline_mode<synchronous>, transform_indices = @transform_3, window_bounds = array<i64: 128, 128>}, {pipeline_mode = #tpu.pipeline_mode<synchronous>, transform_indices = @transform_4, window_bounds = array<i64: 1, 128>}, {pipeline_mode = #tpu.pipeline_mode<synchronous>, transform_indices = @transform_5, window_bounds = array<i64: 2, 128>}]} {
    %c0 = arith.constant 0 : index
    %c0_0 = arith.constant 0 : index
    %c0_1 = arith.constant 0 : index
    %0 = vector.load %arg1[%c0, %c0_0, %c0_1] : memref<1x256x27xbf16, #tpu.memory_space<vmem>>, vector<1x256x27xbf16>
    %1 = vector.shape_cast %0 : vector<1x256x27xbf16> to vector<256x27xbf16>
    %c0_2 = arith.constant 0 : index
    %c0_3 = arith.constant 0 : index
    %2 = vector.load %arg2[%c0_2, %c0_3] : memref<27x128xbf16, #tpu.memory_space<vmem>>, vector<27x128xbf16>
    %cst = arith.constant dense<0.000000e+00> : vector<256x128xf32>
    %3 = tpu.matmul %1, %2, %cst {dimension_numbers = #tpu.dot_dimension_numbers<[1], [0], [0], [1], [0, 0, 1, 1], [], []>} : vector<256x27xbf16>, vector<27x128xbf16>, vector<256x128xf32> -> vector<256x128xf32>
    %c0_4 = arith.constant 0 : index
    %c0_5 = arith.constant 0 : index
    %4 = vector.load %arg3[%c0_4, %c0_5] : memref<1x128xf32, #tpu.memory_space<vmem>>, vector<1x128xf32>
    %5 = vector.broadcast %4 : vector<1x128xf32> to vector<256x128xf32>
    %6 = arith.addf %3, %5 : vector<256x128xf32>
    %cst_6 = arith.constant 0.000000e+00 : f32
    %7 = vector.broadcast %cst_6 : f32 to vector<256x128xf32>
    %8 = arith.maximumf %6, %7 : vector<256x128xf32>
    %9 = arith.mulf %8, %8 : vector<256x128xf32>
    %cst_7 = arith.constant dense<0.000000e+00> : vector<256xf32>
    %10 = vector.multi_reduction <add>, %9, %cst_7 [1] : vector<256x128xf32> to vector<256xf32>
    %11 = vector.shape_cast %10 : vector<256xf32> to vector<256x1xf32>
    %cst_8 = arith.constant 1.000000e-24 : f32
    %12 = vector.broadcast %cst_8 : f32 to vector<256x1xf32>
    %13 = arith.maximumf %11, %12 : vector<256x1xf32>
    %14 = math.rsqrt %13 : vector<256x1xf32>
    %15 = vector.broadcast %14 : vector<256x1xf32> to vector<256x128xf32>
    %16 = arith.mulf %8, %15 : vector<256x128xf32>
    %cst_9 = arith.constant 9.99999997E-7 : f32
    %17 = vector.broadcast %cst_9 : f32 to vector<256x128xf32>
    %18 = arith.maximumf %16, %17 : vector<256x128xf32>
    %19 = arith.mulf %18, %18 : vector<256x128xf32>
    %20 = arith.mulf %19, %18 : vector<256x128xf32>
    %cst_10 = arith.constant dense<0.000000e+00> : vector<128xf32>
    %21 = vector.multi_reduction <add>, %20, %cst_10 [0] : vector<256x128xf32> to vector<128xf32>
    %22 = vector.shape_cast %21 : vector<128xf32> to vector<1x128xf32>
    %cst_11 = arith.constant 2.560000e+02 : f32
    %23 = vector.broadcast %cst_11 : f32 to vector<1x128xf32>
    %24 = arith.divf %22, %23 : vector<1x128xf32>
    %25 = arith.index_cast %arg0 : i32 to index
    %c0_12 = arith.constant 0 : index
    %26 = vector.load %arg7[%25, %c0_12] : memref<2x128xf32, #tpu.memory_space<vmem>>, vector<1x128xf32>
    tpu.vector_store %arg7[%25, %c0_12], %24 {strides = array<i32>} : memref<2x128xf32, #tpu.memory_space<vmem>>, vector<1x128xf32>,
    %c1_i32 = arith.constant 1 : i32
    %27 = arith.cmpi eq, %arg0, %c1_i32 : i32
    %28 = arith.extui %27 : i1 to i32
    %c0_i32 = arith.constant 0 : i32
    %29 = arith.cmpi ne, %28, %c0_i32 : i32
    scf.if %29 {
      %c0_13 = arith.constant 0 : index
      %c0_14 = arith.constant 0 : index
      %30 = vector.load %arg7[%c0_13, %c0_14] : memref<2x128xf32, #tpu.memory_space<vmem>>, vector<2x128xf32>
      %cst_15 = arith.constant 0.333333343 : f32
      %31 = vector.broadcast %cst_15 : f32 to vector<2x128xf32>
      %32 = math.powf %30, %31 : vector<2x128xf32>
      %33 = arith.truncf %32 : vector<2x128xf32> to vector<2x128xbf16>
      %c0_16 = arith.constant 0 : index
      %c0_17 = arith.constant 0 : index
      %34 = vector.load %arg4[%c0_16, %c0_17] : memref<128x128xbf16, #tpu.memory_space<vmem>>, vector<128x128xbf16>
      %cst_18 = arith.constant dense<0.000000e+00> : vector<2x128xf32>
      %35 = tpu.matmul %33, %34, %cst_18 {dimension_numbers = #tpu.dot_dimension_numbers<[1], [0], [0], [1], [0, 0, 1, 1], [], []>} : vector<2x128xbf16>, vector<128x128xbf16>, vector<2x128xf32> -> vector<2x128xf32>
      %c0_19 = arith.constant 0 : index
      %c0_20 = arith.constant 0 : index
      %36 = vector.load %arg5[%c0_19, %c0_20] : memref<1x128xf32, #tpu.memory_space<vmem>>, vector<1x128xf32>
      %37 = vector.broadcast %36 : vector<1x128xf32> to vector<2x128xf32>
      %38 = arith.addf %35, %37 : vector<2x128xf32>
      %39 = arith.mulf %38, %38 : vector<2x128xf32>
      %cst_21 = arith.constant dense<0.000000e+00> : vector<2xf32>
      %40 = vector.multi_reduction <add>, %39, %cst_21 [1] : vector<2x128xf32> to vector<2xf32>
      %41 = vector.shape_cast %40 : vector<2xf32> to vector<2x1xf32>
      %cst_22 = arith.constant 1.000000e-24 : f32
      %42 = vector.broadcast %cst_22 : f32 to vector<2x1xf32>
      %43 = arith.maximumf %41, %42 : vector<2x1xf32>
      %44 = math.rsqrt %43 : vector<2x1xf32>
      %45 = vector.broadcast %44 : vector<2x1xf32> to vector<2x128xf32>
      %46 = arith.mulf %38, %45 : vector<2x128xf32>
      %c0_23 = arith.constant 0 : index
      %c0_24 = arith.constant 0 : index
      %47 = vector.load %arg6[%c0_23, %c0_24] : memref<2x128xf32, #tpu.memory_space<vmem>>, vector<2x128xf32>
      tpu.vector_store %arg6[%c0_23, %c0_24], %46 {strides = array<i32>} : memref<2x128xf32, #tpu.memory_space<vmem>>, vector<2x128xf32>,
    } else {
    }
    return
  }
  func.func @transform_0(%arg0: i32) -> (i32, i32, i32) {
    %c0_i32 = arith.constant 0 : i32
    %c0_i32_0 = arith.constant 0 : i32
    %c0_i32_1 = arith.constant 0 : i32
    return %arg0, %c0_i32, %c0_i32_0 : i32, i32, i32
  }
  func.func @transform_1(%arg0: i32) -> (i32, i32) {
    %c0_i32 = arith.constant 0 : i32
    %c0_i32_0 = arith.constant 0 : i32
    %c0_i32_1 = arith.constant 0 : i32
    return %c0_i32, %c0_i32_0 : i32, i32
  }
  func.func @transform_2(%arg0: i32) -> (i32, i32) {
    %c0_i32 = arith.constant 0 : i32
    %c0_i32_0 = arith.constant 0 : i32
    %c0_i32_1 = arith.constant 0 : i32
    return %c0_i32, %c0_i32_0 : i32, i32
  }
  func.func @transform_3(%arg0: i32) -> (i32, i32) {
    %c0_i32 = arith.constant 0 : i32
    %c0_i32_0 = arith.constant 0 : i32
    %c0_i32_1 = arith.constant 0 : i32
    return %c0_i32, %c0_i32_0 : i32, i32
  }
  func.func @transform_4(%arg0: i32) -> (i32, i32) {
    %c0_i32 = arith.constant 0 : i32
    %c0_i32_0 = arith.constant 0 : i32
    %c0_i32_1 = arith.constant 0 : i32
    return %c0_i32, %c0_i32_0 : i32, i32
  }
  func.func @transform_5(%arg0: i32) -> (i32, i32) {
    %c0_i32 = arith.constant 0 : i32
    %c0_i32_0 = arith.constant 0 : i32
    %c0_i32_1 = arith.constant 0 : i32
    return %c0_i32, %c0_i32_0 : i32, i32
  }
}

</mosaic_0001>

<bundles_post_ra>
// kernel: tpu_custom_call.1
= control target key start
LH: loop header
LB: loop body
LE: loop exit
PB: predicated region body
PF: predicated region fallthrough
CT: control target
= control target key end

     0   :  { %10 = vsyncpa [#allocation4], 0  ;;  %s1449_s18 = smov 0   ;;  %s1768_s0 = inlined_call_operand.vmem [shape: bf16[2,256,27], index: 0, kind: input, shape index: {}]   ;;  %s1769_s1 = inlined_call_operand.vmem [shape: bf16[27,128], index: 1, kind: input, shape index: {}]   ;;  %s1770_s2 = inlined_call_operand.vmem [shape: f32[1,128], index: 2, kind: input, shape index: {}]   ;;  %s1771_s3 = inlined_call_operand.vmem [shape: bf16[128,128], index: 3, kind: input, shape index: {}]   ;;  %s1772_s4 = inlined_call_operand.vmem [shape: f32[1,128], index: 4, kind: input, shape index: {}]   ;;  %s1773_s5 = inlined_call_operand.hbm [shape: f32[2,128], index: 5, kind: output, shape index: {}]  }
   0x1 LB: > { %s1455_s19 = sadd.s32 4294967295, %s1413_s18   ;;  %p1101_p0 = scmp.ge.s32.totalorder %s1413_s18, 1  ;;  %s1413_s18 = sphi %s1449_s18, %s16_s18  }
   0x2   : > { %p183_p1 = scmp.lt.s32.totalorder %s1413_s18, 3 }
   0x4   : > { %p184_p2 = pnand %p1101_p0, %p183_p1 }
   0x5   : > { %v1281_v0 = vld [vmem:[%s1769_s1] sm:$0xff] (!%p184_p2)   ;;  %vm395_vm0 = vcmask (!%p184_p2), 1044480   ;;  %v1282_v1 = vld [vmem:[%s1769_s1 + $0x8] sm:$0x3f] (!%p184_p2)   ;;  %vm396_vm1 = vcmask (!%p184_p2), 1045504   ;;  %p206_p3 = scmp.lt.s32.totalorder (!%p184_p2), %s1455_s19, 1 }
   0x6   : > { %187 = sbr.rel (%p184_p2) target bundleno = 924 (0x39c), region = 40  ;;  %1185 = vmatprep.subr.bf16.mxu0 (!%p184_p2), %v1281_v0  ;;  %1241 = vmatprep.subr.bf16.mxu1 (!%p184_p2), %v1281_v0  ;;  %v1415_v2 = vmov (!%p184_p2), 65535   ;;  %vm346_vm2 = vcmask (!%p184_p2), 220160   ;;  %v1507_v22 = vld [vmem:[%s1770_s2] ss:$0 sm:$0xff] (!%p184_p2)  ;;  %s1155_s6 = scalar_lea.vmem (!%p184_p2), [#allocation2], %s1413_s18 }
   0x7   : > { %1186 = vmatpush3.bf16.msra.mxu0 (!%p184_p2), %v1281_v0  ;;  %v397_v3 = vsel (!%p184_p2), %vm395_vm0, 4294967295, %v1415_v2  ;;  %1243 = vmatpush3.bf16.msra.mxu1 (!%p184_p2), %v1281_v0  ;;  %p1140_p4 = scmp.ne.s32.totalorder (!%p184_p2), %s1455_s19, 1 }
   0x8   : > { %v398_v4 = vsel (!%p184_p2), %vm396_vm1, %v397_v3, 0 }
   0x9   : > { %v400_v5 = vand.u32 (!%p184_p2), %v1282_v1, %v398_v4 }
   0xb   : > { %1187 = vmatprep.subr.bf16.mxu0 (!%p184_p2), %v400_v5  ;;  %1242 = vmatprep.subr.bf16.mxu1 (!%p184_p2), %v400_v5 }
   0xc   : > { %1188 = vmatpush3.bf16.msra.mxu0 (!%p184_p2), %v400_v5  ;;  %1244 = vmatpush3.bf16.msra.mxu1 (!%p184_p2), %v400_v5 }
   0xd   : > { %s207_s24 = scalar_select %p206_p3, %s1455_s19, 1 }
   0xe   : > { %vm1417_vm3 = vmmov (!%p1140_p4), 0   ;;  %vm1043_vm9 = vcmask (!%p1140_p4), 1041408  }
   0xf   : > { %s1154_s25 = sshll.u32 %s207_s24, 7 }
  0x10   : > { %s1470_s28 = scalar_lea.vmem %s1768_s0, %s1154_s25 }
  0x11   : > { %v1283_v6 = vld [vmem:[%s1470_s28] sm:$0xff]   ;;  %v1284_v7 = vld [vmem:[%s1470_s28 + $0x8] sm:$0xff]   ;;  %v1285_v8 = vld [vmem:[%s1470_s28 + $0x10] sm:$0xff]  }
  0x12   : > { %1189 = vmatprep.mubr.msk.bf16.mxu0 %vm346_vm2, %v1283_v6  ;;  %v1286_v9 = vld [vmem:[%s1470_s28 + $0x18] sm:$0xff]   ;;  %v1287_v10 = vld [vmem:[%s1470_s28 + $0x20] sm:$0xff]   ;;  %v1292_v12 = vld [vmem:[%s1470_s28 + $0x48] sm:$0xff]  }
  0x13   : > { %1190 = vmatmul.mubr.msk.bf16.vlgmr.msra.gmra.mrb[0].mxu0 %vm346_vm2, %v1284_v7  ;;  %v1291_v11 = vld [vmem:[%s1470_s28 + $0x40] sm:$0xff]   ;;  %v1293_v13 = vld [vmem:[%s1470_s28 + $0x50] sm:$0xff]   ;;  %v1288_v14 = vld [vmem:[%s1470_s28 + $0x28] sm:$0xff]  }
  0x14   : > { %1193 = vmatprep.mubr.msk.bf16.mxu0 %vm346_vm2, %v1285_v8  ;;  %1205 = vmatprep.mubr.msk.bf16.mxu1 %vm346_vm2, %v1291_v11  ;;  %v1294_v15 = vld [vmem:[%s1470_s28 + $0x58] sm:$0xff]   ;;  %v1289_v16 = vld [vmem:[%s1470_s28 + $0x30] sm:$0xff]   ;;  %v1295_v17 = vld [vmem:[%s1470_s28 + $0x60] sm:$0xff]  }
  0x15   : > { %1206 = vmatmul.mubr.msk.bf16.vlgmr.msra.gmra.mrb[0].mxu1 %vm346_vm2, %v1292_v12  ;;  %v1290_v18 = vld [vmem:[%s1470_s28 + $0x38] sm:$0xff]   ;;  %v1296_v19 = vld [vmem:[%s1470_s28 + $0x68] sm:$0xff]   ;;  %v1297_v20 = vld [vmem:[%s1470_s28 + $0x70] sm:$0xff]  }
  0x16   : > { %1209 = vmatprep.mubr.msk.bf16.mxu1 %vm346_vm2, %v1293_v13  ;;  %v1298_v21 = vld [vmem:[%s1470_s28 + $0x78] sm:$0xff]  }
  0x1b   : > { %1194 = vmatmul.mubr.msk.bf16.gmra.mrb[4].mxu0 %vm346_vm2, %v1286_v9 }
  0x1c   : > { %1197 = vmatprep.mubr.msk.bf16.mxu0 %vm346_vm2, %v1287_v10 }
  0x1d   : > { %1210 = vmatmul.mubr.msk.bf16.gmra.mrb[4].mxu1 %vm346_vm2, %v1294_v15 }
  0x1e   : > { %1213 = vmatprep.mubr.msk.bf16.mxu1 %vm346_vm2, %v1295_v17 }
  0x23   : > { %1198 = vmatmul.mubr.msk.bf16.gmra.mrb[8].mxu0 %vm346_vm2, %v1288_v14 }
  0x24   : > { %1201 = vmatprep.mubr.msk.bf16.mxu0 %vm346_vm2, %v1289_v16 }
  0x25   : > { %1214 = vmatmul.mubr.msk.bf16.gmra.mrb[8].mxu1 %vm346_vm2, %v1296_v19 }
  0x26   : > { %1217 = vmatprep.mubr.msk.bf16.mxu1 %vm346_vm2, %v1297_v20 }
  0x2b   : > { %1202 = vmatmul.mubr.msk.bf16.gmra.mrb[12].mxu0 %vm346_vm2, %v1290_v18 }
  0x2d   : > { %1218 = vmatmul.mubr.msk.bf16.gmra.mrb[12].mxu1 %vm346_vm2, %v1298_v21 }
  0xe6   : > { %v1191_v23 = vpop.f32.mrb[0].mxu0 }
  0xe7   : > { %v445_v24 = vadd.f32 %v1191_v23, %v1507_v22  ;;  %v436_v25 = vpop.f32.mrb[1].mxu0 }
  0xe8   : > { %v437_v26 = vadd.f32 %v1507_v22, %v436_v25  ;;  %v1192_v27 = vpop.f32.mrb[2].mxu0  ;;  %v1525_v38 = vpop.f32.mrb[0].mxu1 }
  0xe9   : > { %v1511_v28 = vmax.f32 %v445_v24, 0.0  ;;  %v448_v29 = vadd.f32 %v1192_v27, %v1507_v22  ;;  %v439_v30 = vpop.f32.mrb[3].mxu0  ;;  %v500_v41 = vpop.f32.mrb[1].mxu1 }
  0xea   : > { %v1514_v31 = vmax.f32 %v437_v26, 0.0  ;;  %v440_v32 = vadd.f32 %v1507_v22, %v439_v30  ;;  %v1533_v46 = vpop.f32.mrb[2].mxu1  ;;  %v501_v24 = vadd.f32 %v1507_v22, %v500_v41 }
  0xeb   : > { %v1517_v33 = vmax.f32 %v448_v29, 0.0  ;;  %v597_v34 = vmul.f32 %v1511_v28, %v1511_v28  ;;  %v503_v48 = vpop.f32.mrb[3].mxu1 }
  0xec   : > { %v1521_v35 = vmax.f32 %v440_v32, 0.0  ;;  %v595_v36 = vmul.f32 %v1514_v31, %v1514_v31 }
  0xed   : > { %631 = vadd.xlane.f32.xlu1 %v597_v34  ;;  %v598_v40 = vmul.f32 %v1517_v33, %v1517_v33 }
  0xee   : > { %v1195_v37 = vpop.f32.mrb[4].mxu0  ;;  %627 = vadd.xlane.f32.xlu0 %v595_v36  ;;  %v596_v45 = vmul.f32 %v1521_v35, %v1521_v35 }
  0xef   : > { %v452_v39 = vpop.f32.mrb[5].mxu0  ;;  %v461_v42 = vadd.f32 %v1195_v37, %v1507_v22  ;;  %v504_v37 = vadd.f32 %v1507_v22, %v503_v48 }
  0xf0   : > { %v453_v43 = vadd.f32 %v1507_v22, %v452_v39  ;;  %v1196_v44 = vpop.f32.mrb[6].mxu0  ;;  %v1549_v58 = vpop.f32.mrb[4].mxu1 }
  0xf1   : > { %633 = vadd.xlane.f32.xlu1 %v598_v40  ;;  %v455_v47 = vpop.f32.mrb[7].mxu0  ;;  %v464_v50 = vadd.f32 %v1196_v44, %v1507_v22  ;;  %v1539_v52 = vmax.f32 %v461_v42, 0.0  ;;  %v516_v60 = vpop.f32.mrb[5].mxu1  ;;  %v1593_v40 = vmax.f32 %v501_v24, 0.0  ;;  %v509_v44 = vadd.f32 %v1525_v38, %v1507_v22 }
  0xf2   : > { %v1535_v49 = vmax.f32 %v453_v43, 0.0  ;;  %v456_v51 = vadd.f32 %v1507_v22, %v455_v47  ;;  %629 = vadd.xlane.f32.xlu0 %v596_v45  ;;  %v1555_v1 = vpop.f32.mrb[6].mxu1  ;;  %v1599_v45 = vmax.f32 %v504_v37, 0.0 }
  0xf3   : > { %v1545_v55 = vmax.f32 %v464_v50, 0.0  ;;  %v601_v0 = vmul.f32 %v1539_v52, %v1539_v52  ;;  %v519_v3 = vpop.f32.mrb[7].mxu1  ;;  %v611_v38 = vmul.f32 %v1593_v40, %v1593_v40 }
  0xf4   : > { %v1541_v53 = vmax.f32 %v456_v51, 0.0  ;;  %v599_v54 = vmul.f32 %v1535_v49, %v1535_v49  ;;  %v512_v51 = vadd.f32 %v1533_v46, %v1507_v22 }
  0xf5   : > { %v602_v7 = vmul.f32 %v1545_v55, %v1545_v55 }
  0xf6   : > { %v1199_v56 = vpop.f32.mrb[8].mxu0  ;;  %635 = vadd.xlane.f32.xlu0 %v599_v54  ;;  %v600_v57 = vmul.f32 %v1541_v53, %v1541_v53 }
  0xf7   : > { %v468_v59 = vpop.f32.mrb[9].mxu0  ;;  %v477_v61 = vadd.f32 %v1199_v56, %v1507_v22  ;;  %v517_v56 = vadd.f32 %v1507_v22, %v516_v60 }
  0xf8   : > { %v469_v62 = vadd.f32 %v1507_v22, %v468_v59  ;;  %v1200_v63 = vpop.f32.mrb[10].mxu0  ;;  %637 = vadd.xlane.f32.xlu1 %v600_v57  ;;  %v1215_v14 = vpop.f32.mrb[8].mxu1  ;;  %v1610_v57 = vmax.f32 %v509_v44, 0.0  ;;  %v520_v59 = vadd.f32 %v1507_v22, %v519_v3 }
  0xf9   : > { %v471_v2 = vpop.f32.mrb[11].mxu0  ;;  %v480_v5 = vadd.f32 %v1200_v63, %v1507_v22  ;;  %v1563_v8 = vmax.f32 %v477_v61, 0.0  ;;  %v532_v16 = vpop.f32.mrb[9].mxu1  ;;  %v612_v61 = vmul.f32 %v1599_v45, %v1599_v45  ;;  %v1617_v46 = vmax.f32 %v517_v56, 0.0 }
  0xfa   : > { %v1557_v4 = vmax.f32 %v469_v62, 0.0  ;;  %v472_v6 = vadd.f32 %v1507_v22, %v471_v2  ;;  %639 = vadd.xlane.f32.xlu0 %v601_v0  ;;  %v1216_v21 = vpop.f32.mrb[10].mxu1  ;;  %v1615_v62 = vmax.f32 %v512_v51, 0.0  ;;  %v525_v63 = vadd.f32 %v1549_v58, %v1507_v22 }
  0xfb   : > { %v1569_v11 = vmax.f32 %v480_v5, 0.0  ;;  %v605_v20 = vmul.f32 %v1563_v8, %v1563_v8  ;;  %v535_v25 = vpop.f32.mrb[11].mxu1  ;;  %v1621_v60 = vmax.f32 %v520_v59, 0.0  ;;  %v613_v0 = vmul.f32 %v1610_v57, %v1610_v57 }
  0xfc   : > { %v1565_v9 = vmax.f32 %v472_v6, 0.0  ;;  %641 = vadd.xlane.f32.xlu1 %v602_v7  ;;  %v603_v10 = vmul.f32 %v1557_v4, %v1557_v4  ;;  %v528_v2 = vadd.f32 %v1555_v1, %v1507_v22  ;;  %v614_v3 = vmul.f32 %v1615_v62, %v1615_v62 }
  0xfd   : > { %v606_v30 = vmul.f32 %v1569_v11, %v1569_v11  ;;  %v533_v5 = vadd.f32 %v1507_v22, %v532_v16  ;;  %v615_v6 = vmul.f32 %v1617_v46, %v1617_v46  ;;  %v1632_v7 = vmax.f32 %v525_v63, 0.0 }
  0xfe   : > { %v1203_v12 = vpop.f32.mrb[12].mxu0  ;;  %643 = vadd.xlane.f32.xlu0 %v603_v10  ;;  %v604_v13 = vmul.f32 %v1565_v9, %v1565_v9  ;;  %v536_v58 = vadd.f32 %v1507_v22, %v535_v25  ;;  %v616_v10 = vmul.f32 %v1621_v60, %v1621_v60 }
  0xff   : > { %v484_v15 = vpop.f32.mrb[13].mxu0  ;;  %v493_v17 = vadd.f32 %v1203_v12, %v1507_v22  ;;  %v1637_v12 = vmax.f32 %v528_v2, 0.0  ;;  %v1639_v1 = vmax.f32 %v533_v5, 0.0  ;;  %v617_v16 = vmul.f32 %v1632_v7, %v1632_v7 }
 0x100   : > { %v485_v18 = vadd.f32 %v1507_v22, %v484_v15  ;;  %v1204_v19 = vpop.f32.mrb[14].mxu0  ;;  %645 = vadd.xlane.f32.xlu1 %v604_v13  ;;  %v1219_v42 = vpop.f32.mrb[12].mxu1  ;;  %v541_v13 = vadd.f32 %v1215_v14, %v1507_v22  ;;  %v1642_v15 = vmax.f32 %v536_v58, 0.0 }
 0x101   : > { %v487_v23 = vpop.f32.mrb[15].mxu0  ;;  %v496_v27 = vadd.f32 %v1204_v19, %v1507_v22  ;;  %v1584_v32 = vmax.f32 %v493_v17, 0.0  ;;  %v548_v43 = vpop.f32.mrb[13].mxu1  ;;  %v544_v17 = vadd.f32 %v1216_v21, %v1507_v22 }
 0x102   : > { %v1578_v26 = vmax.f32 %v485_v18, 0.0  ;;  %v488_v29 = vadd.f32 %v1507_v22, %v487_v23  ;;  %647 = vadd.xlane.f32.xlu0 %v605_v20  ;;  %v1220_v48 = vpop.f32.mrb[14].mxu1  ;;  %v618_v18 = vmul.f32 %v1637_v12, %v1637_v12  ;;  %v549_v19 = vadd.f32 %v1507_v22, %v548_v43 }
 0x103   : > { %v1591_v39 = vmax.f32 %v496_v27, 0.0  ;;  %v609_v47 = vmul.f32 %v1584_v32, %v1584_v32  ;;  %v551_v50 = vpop.f32.mrb[15].mxu1  ;;  %v619_v20 = vmul.f32 %v1639_v1, %v1639_v1  ;;  %v1652_v23 = vmax.f32 %v541_v13, 0.0 }
 0x104   : > { %v1586_v34 = vmax.f32 %v488_v29, 0.0  ;;  %649 = vadd.xlane.f32.xlu1 %v606_v30  ;;  %v607_v36 = vmul.f32 %v1578_v26, %v1578_v26  ;;  %v552_v14 = vadd.f32 %v1507_v22, %v551_v50  ;;  %v620_v24 = vmul.f32 %v1642_v15, %v1642_v15 }
 0x105   : > { %v610_v54 = vmul.f32 %v1591_v39, %v1591_v39  ;;  %v1657_v25 = vmax.f32 %v544_v17, 0.0  ;;  %v1659_v21 = vmax.f32 %v549_v19, 0.0  ;;  %v557_v27 = vadd.f32 %v1219_v42, %v1507_v22 }
 0x106   : > { %651 = vadd.xlane.f32.xlu0 %v607_v36  ;;  %v608_v41 = vmul.f32 %v1586_v34, %v1586_v34  ;;  %v1662_v29 = vmax.f32 %v552_v14, 0.0  ;;  %v621_v30 = vmul.f32 %v1652_v23, %v1652_v23  ;;  %v560_v36 = vadd.f32 %v1220_v48, %v1507_v22 }
 0x107   : > { %v622_v37 = vmul.f32 %v1657_v25, %v1657_v25  ;;  %v1671_v43 = vmax.f32 %v557_v27, 0.0 }
 0x108   : > { %653 = vadd.xlane.f32.xlu1 %v608_v41  ;;  %v623_v41 = vmul.f32 %v1659_v21, %v1659_v21  ;;  %v624_v42 = vmul.f32 %v1662_v29, %v1662_v29  ;;  %v1675_v44 = vmax.f32 %v560_v36, 0.0 }
 0x109   : > { %v625_v22 = vmul.f32 %v1671_v43, %v1671_v43 }
 0x10a   : > { %655 = vadd.xlane.f32.xlu0 %v609_v47  ;;  %v626_v47 = vmul.f32 %v1675_v44, %v1675_v44 }
 0x10c   : > { %657 = vadd.xlane.f32.xlu1 %v610_v54 }
 0x10e   : > { %659 = vadd.xlane.f32.xlu0 %v611_v38 }
 0x110   : > { %661 = vadd.xlane.f32.xlu1 %v612_v61 }
 0x112   : > { %663 = vadd.xlane.f32.xlu0 %v613_v0 }
 0x114   : > { %665 = vadd.xlane.f32.xlu1 %v614_v3 }
 0x116   : > { %667 = vadd.xlane.f32.xlu0 %v615_v6 }
 0x118   : > { %669 = vadd.xlane.f32.xlu1 %v616_v10 }
 0x11a   : > { %671 = vadd.xlane.f32.xlu0 %v617_v16 }
 0x11c   : > { %673 = vadd.xlane.f32.xlu1 %v618_v18 }
 0x11e   : > { %675 = vadd.xlane.f32.xlu0 %v619_v20 }
 0x120   : > { %677 = vadd.xlane.f32.xlu1 %v620_v24 }
 0x122   : > { %679 = vadd.xlane.f32.xlu0 %v621_v30 }
 0x124   : > { %681 = vadd.xlane.f32.xlu1 %v622_v37 }
 0x126   : > { %683 = vadd.xlane.f32.xlu0 %v623_v41 }
 0x128   : > { %685 = vadd.xlane.f32.xlu1 %v624_v42 }
 0x12a   : > { %687 = vadd.xlane.f32.xlu0 %v625_v22 }
 0x12c   : > { %689 = vadd.xlane.f32.xlu1 %v626_v47 }
 0x17a   : > { %v632_v48 = vpop.xlane.xlu1 %631 }
 0x17b   : > { %v693_v50 = vmax.f32 %v632_v48, 1e-24  ;;  %v628_v51 = vpop.xlane.xlu0 %627 }
 0x17c   : > { %v691_v54 = vmax.f32 %v628_v51, 1e-24 }
 0x17d   : > { %1299 = vrsqrt.f32 %v693_v50 }
 0x17e   : > { %1301 = vrsqrt.f32 %v691_v54  ;;  %v634_v56 = vpop.xlane.xlu1 %633 }
 0x17f   : > { %v694_v38 = vmax.f32 %v634_v56, 1e-24  ;;  %v630_v59 = vpop.xlane.xlu0 %629 }
 0x180   : > { %v692_v61 = vmax.f32 %v630_v59, 1e-24 }
 0x181   : > { %1303 = vrsqrt.f32 %v694_v38 }
 0x182   : > { %1305 = vrsqrt.f32 %v692_v61 }
 0x183   : > { %v636_v63 = vpop.xlane.xlu0 %635 }
 0x184   : > { %v695_v0 = vmax.f32 %v636_v63, 1e-24 }
 0x185   : > { %v638_v2 = vpop.xlane.xlu1 %637 }
 0x186   : > { %1307 = vrsqrt.f32 %v695_v0  ;;  %v696_v3 = vmax.f32 %v638_v2, 1e-24 }
 0x187   : > { %v1300_v5 = vpop.eup %1299  ;;  %v640_v6 = vpop.xlane.xlu0 %639 }
 0x188   : > { %v1302_v58 = vpop.eup %1301  ;;  %v757_v10 = vmul.f32 %v1300_v5, %v1511_v28  ;;  %1309 = vrsqrt.f32 %v696_v3  ;;  %v697_v13 = vmax.f32 %v640_v6, 1e-24 }
 0x189   : > { %v755_v16 = vmul.f32 %v1302_v58, %v1514_v31  ;;  %v642_v17 = vpop.xlane.xlu1 %641 }
 0x18a   : > { %1311 = vrsqrt.f32 %v697_v13  ;;  %v698_v18 = vmax.f32 %v642_v17, 1e-24  ;;  %v789_v27 = vmax.f32 %v757_v10, 1e-06 }
 0x18b   : > { %v1304_v19 = vpop.eup %1303  ;;  %v787_v20 = vmax.f32 %v755_v16, 1e-06  ;;  %v644_v14 = vpop.xlane.xlu0 %643 }
 0x18c   : > { %v1306_v24 = vpop.eup %1305  ;;  %v758_v30 = vmul.f32 %v1304_v19, %v1517_v33  ;;  %1313 = vrsqrt.f32 %v698_v18  ;;  %v699_v36 = vmax.f32 %v644_v14, 1e-24  ;;  %v821_v50 = vmul.f32 %v789_v27, %v789_v27 }
 0x18d   : > { %v756_v37 = vmul.f32 %v1306_v24, %v1521_v35  ;;  %v646_v41 = vpop.xlane.xlu1 %645  ;;  %v819_v28 = vmul.f32 %v787_v20, %v787_v20 }
 0x18e   : > { %1315 = vrsqrt.f32 %v699_v36  ;;  %v700_v42 = vmax.f32 %v646_v41, 1e-24  ;;  %v790_v22 = vmax.f32 %v758_v30, 1e-06  ;;  %v853_v6 = vmul.f32 %v821_v50, %v789_v27 }
 0x18f   : > { %v788_v31 = vmax.f32 %v756_v37, 1e-06  ;;  %v648_v47 = vpop.xlane.xlu0 %647  ;;  %v851_v59 = vmul.f32 %v819_v28, %v787_v20 }
 0x190   : > { %v1308_v48 = vpop.eup %1307  ;;  %1317 = vrsqrt.f32 %v700_v42  ;;  %v701_v51 = vmax.f32 %v648_v47, 1e-24  ;;  %v822_v35 = vmul.f32 %v790_v22, %v790_v22 }
 0x191   : > { %v820_v54 = vmul.f32 %v788_v31, %v788_v31  ;;  %v759_v56 = vmul.f32 %v1308_v48, %v1535_v49  ;;  %v650_v38 = vpop.xlane.xlu1 %649 }
 0x192   : > { %v1310_v33 = vpop.eup %1309  ;;  %1319 = vrsqrt.f32 %v701_v51  ;;  %v702_v61 = vmax.f32 %v650_v38, 1e-24  ;;  %v854_v20 = vmul.f32 %v822_v35, %v790_v22 }
 0x193   : > { %v852_v63 = vmul.f32 %v820_v54, %v788_v31  ;;  %v791_v0 = vmax.f32 %v759_v56, 1e-06  ;;  %v760_v2 = vmul.f32 %v1310_v33, %v1541_v53  ;;  %v652_v3 = vpop.xlane.xlu0 %651 }
 0x194   : > { %v1312_v5 = vpop.eup %1311  ;;  %1321 = vrsqrt.f32 %v702_v61  ;;  %v703_v58 = vmax.f32 %v652_v3, 1e-24 }
 0x195   : > { %v883_v10 = vadd.f32 %v852_v63, %v851_v59  ;;  %v823_v13 = vmul.f32 %v791_v0, %v791_v0  ;;  %v792_v16 = vmax.f32 %v760_v2, 1e-06  ;;  %v761_v49 = vmul.f32 %v1312_v5, %v1539_v52  ;;  %v654_v17 = vpop.xlane.xlu1 %653 }
 0x196   : > { %v1314_v18 = vpop.eup %1313  ;;  %1323 = vrsqrt.f32 %v703_v58  ;;  %v704_v19 = vmax.f32 %v654_v17, 1e-24 }
 0x197   : > { %v884_v14 = vadd.f32 %v883_v10, %v853_v6  ;;  %v824_v24 = vmul.f32 %v792_v16, %v792_v16  ;;  %v793_v30 = vmax.f32 %v761_v49, 1e-06  ;;  %v656_v36 = vpop.xlane.xlu0 %655  ;;  %v762_v37 = vmul.f32 %v1314_v18, %v1545_v55 }
 0x198   : > { %v1316_v53 = vpop.eup %1315  ;;  %1325 = vrsqrt.f32 %v704_v19  ;;  %v705_v27 = vmax.f32 %v656_v36, 1e-24  ;;  %v855_v28 = vmul.f32 %v823_v13, %v791_v0 }
 0x199   : > { %v885_v41 = vadd.f32 %v884_v14, %v854_v20  ;;  %v825_v42 = vmul.f32 %v793_v30, %v793_v30  ;;  %v763_v31 = vmul.f32 %v1316_v53, %v1557_v4  ;;  %v658_v52 = vpop.xlane.xlu1 %657  ;;  %v794_v48 = vmax.f32 %v762_v37, 1e-06 }
 0x19a   : > { %v1318_v47 = vpop.eup %1317  ;;  %1327 = vrsqrt.f32 %v705_v27  ;;  %v706_v50 = vmax.f32 %v658_v52, 1e-24  ;;  %v856_v51 = vmul.f32 %v824_v24, %v792_v16 }
 0x19b   : > { %v886_v22 = vadd.f32 %v885_v41, %v855_v28  ;;  %v795_v54 = vmax.f32 %v763_v31, 1e-06  ;;  %v764_v56 = vmul.f32 %v1318_v47, %v1565_v9  ;;  %v660_v38 = vpop.xlane.xlu0 %659  ;;  %v857_v55 = vmul.f32 %v825_v42, %v793_v30 }
 0x19c   : > { %v1320_v33 = vpop.eup %1319  ;;  %v826_v59 = vmul.f32 %v794_v48, %v794_v48  ;;  %1329 = vrsqrt.f32 %v706_v50  ;;  %v707_v61 = vmax.f32 %v660_v38, 1e-24 }
 0x19d   : > { %v887_v35 = vadd.f32 %v886_v22, %v856_v51  ;;  %v827_v63 = vmul.f32 %v795_v54, %v795_v54  ;;  %v796_v0 = vmax.f32 %v764_v56, 1e-06  ;;  %v765_v4 = vmul.f32 %v1320_v33, %v1563_v8  ;;  %v662_v2 = vpop.xlane.xlu1 %661 }
 0x19e   : > { %v1322_v3 = vpop.eup %1321  ;;  %1331 = vrsqrt.f32 %v707_v61  ;;  %v708_v5 = vmax.f32 %v662_v2, 1e-24  ;;  %v858_v58 = vmul.f32 %v826_v59, %v794_v48 }
 0x19f   : > { %v888_v6 = vadd.f32 %v887_v35, %v857_v55  ;;  %v828_v10 = vmul.f32 %v796_v0, %v796_v0  ;;  %v797_v13 = vmax.f32 %v765_v4, 1e-06  ;;  %v664_v9 = vpop.xlane.xlu0 %663  ;;  %v766_v49 = vmul.f32 %v1322_v3, %v1569_v11 }
 0x1a0   : > { %v1324_v16 = vpop.eup %1323  ;;  %1333 = vrsqrt.f32 %v708_v5  ;;  %v709_v17 = vmax.f32 %v664_v9, 1e-24  ;;  %v859_v19 = vmul.f32 %v827_v63, %v795_v54 }
 0x1a1   : > { %v889_v18 = vadd.f32 %v888_v6, %v858_v58  ;;  %v829_v20 = vmul.f32 %v797_v13, %v797_v13  ;;  %v767_v14 = vmul.f32 %v1324_v16, %v1578_v26  ;;  %v666_v8 = vpop.xlane.xlu1 %665  ;;  %v798_v30 = vmax.f32 %v766_v49, 1e-06 }
 0x1a2   : > { %v1326_v24 = vpop.eup %1325  ;;  %1335 = vrsqrt.f32 %v709_v17  ;;  %v710_v36 = vmax.f32 %v666_v8, 1e-24  ;;  %v860_v37 = vmul.f32 %v828_v10, %v796_v0 }
 0x1a3   : > { %v890_v53 = vadd.f32 %v889_v18, %v859_v19  ;;  %v799_v27 = vmax.f32 %v767_v14, 1e-06  ;;  %v768_v41 = vmul.f32 %v1326_v24, %v1586_v34  ;;  %v668_v28 = vpop.xlane.xlu0 %667  ;;  %v861_v11 = vmul.f32 %v829_v20, %v797_v13 }
 0x1a4   : > { %v1328_v42 = vpop.eup %1327  ;;  %v830_v31 = vmul.f32 %v798_v30, %v798_v30  ;;  %1337 = vrsqrt.f32 %v710_v36  ;;  %v711_v52 = vmax.f32 %v668_v28, 1e-24 }
 0x1a5   : > { %v891_v47 = vadd.f32 %v890_v53, %v860_v37  ;;  %v831_v48 = vmul.f32 %v799_v27, %v799_v27  ;;  %v800_v50 = vmax.f32 %v768_v41, 1e-06  ;;  %v769_v26 = vmul.f32 %v1328_v42, %v1584_v32  ;;  %v670_v22 = vpop.xlane.xlu1 %669 }
 0x1a6   : > { %v1330_v51 = vpop.eup %1329  ;;  %1339 = vrsqrt.f32 %v711_v52  ;;  %v712_v54 = vmax.f32 %v670_v22, 1e-24  ;;  %v862_v38 = vmul.f32 %v830_v31, %v798_v30 }
 0x1a7   : > { %v892_v56 = vadd.f32 %v891_v47, %v861_v11  ;;  %v832_v33 = vmul.f32 %v800_v50, %v800_v50  ;;  %v801_v55 = vmax.f32 %v769_v26, 1e-06  ;;  %v672_v34 = vpop.xlane.xlu0 %671  ;;  %v770_v61 = vmul.f32 %v1330_v51, %v1591_v39 }
 0x1a8   : > { %v1332_v59 = vpop.eup %1331  ;;  %1341 = vrsqrt.f32 %v712_v54  ;;  %v713_v35 = vmax.f32 %v672_v34, 1e-24  ;;  %v863_v0 = vmul.f32 %v831_v48, %v799_v27 }
 0x1a9   : > { %v893_v63 = vadd.f32 %v892_v56, %v862_v38  ;;  %v833_v4 = vmul.f32 %v801_v55, %v801_v55  ;;  %v771_v2 = vmul.f32 %v1332_v59, %v1593_v40  ;;  %v674_v32 = vpop.xlane.xlu1 %673  ;;  %v802_v5 = vmax.f32 %v770_v61, 1e-06 }
 0x1aa   : > { %v1334_v3 = vpop.eup %1333  ;;  %1343 = vrsqrt.f32 %v713_v35  ;;  %v714_v6 = vmax.f32 %v674_v32, 1e-24  ;;  %v864_v10 = vmul.f32 %v832_v33, %v800_v50 }
 0x1ab   : > { %v894_v58 = vadd.f32 %v893_v63, %v863_v0  ;;  %v803_v13 = vmax.f32 %v771_v2, 1e-06  ;;  %v772_v9 = vmul.f32 %v1334_v3, %v1599_v45  ;;  %v676_v16 = vpop.xlane.xlu0 %675  ;;  %v865_v39 = vmul.f32 %v833_v4, %v801_v55 }
 0x1ac   : > { %v1336_v49 = vpop.eup %1335  ;;  %v834_v17 = vmul.f32 %v802_v5, %v802_v5  ;;  %1345 = vrsqrt.f32 %v714_v6  ;;  %v715_v18 = vmax.f32 %v676_v16, 1e-24 }
 0x1ad   : > { %v895_v19 = vadd.f32 %v894_v58, %v864_v10  ;;  %v835_v20 = vmul.f32 %v803_v13, %v803_v13  ;;  %v804_v14 = vmax.f32 %v772_v9, 1e-06  ;;  %v773_v40 = vmul.f32 %v1336_v49, %v1610_v57  ;;  %v678_v8 = vpop.xlane.xlu1 %677 }
 0x1ae   : > { %v1338_v24 = vpop.eup %1337  ;;  %1347 = vrsqrt.f32 %v715_v18  ;;  %v716_v30 = vmax.f32 %v678_v8, 1e-24  ;;  %v866_v53 = vmul.f32 %v834_v17, %v802_v5 }
 0x1af   : > { %v896_v36 = vadd.f32 %v895_v19, %v865_v39  ;;  %v836_v37 = vmul.f32 %v804_v14, %v804_v14  ;;  %v805_v27 = vmax.f32 %v773_v40, 1e-06  ;;  %v680_v45 = vpop.xlane.xlu0 %679  ;;  %v774_v28 = vmul.f32 %v1338_v24, %v1615_v62 }
 0x1b0   : > { %v1340_v41 = vpop.eup %1339  ;;  %1349 = vrsqrt.f32 %v716_v30  ;;  %v717_v42 = vmax.f32 %v680_v45, 1e-24  ;;  %v867_v31 = vmul.f32 %v835_v20, %v803_v13 }
 0x1b1   : > { %v897_v11 = vadd.f32 %v896_v36, %v866_v53  ;;  %v837_v52 = vmul.f32 %v805_v27, %v805_v27  ;;  %v775_v47 = vmul.f32 %v1340_v41, %v1617_v46  ;;  %v682_v57 = vpop.xlane.xlu1 %681  ;;  %v806_v50 = vmax.f32 %v774_v28, 1e-06 }
 0x1b2   : > { %v1342_v48 = vpop.eup %1341  ;;  %1351 = vrsqrt.f32 %v717_v42  ;;  %v718_v26 = vmax.f32 %v682_v57, 1e-24  ;;  %v868_v51 = vmul.f32 %v836_v37, %v804_v14 }
 0x1b3   : > { %v898_v22 = vadd.f32 %v897_v11, %v867_v31  ;;  %v807_v54 = vmax.f32 %v775_v47, 1e-06  ;;  %v776_v56 = vmul.f32 %v1342_v48, %v1621_v60  ;;  %v684_v38 = vpop.xlane.xlu0 %683  ;;  %v869_v62 = vmul.f32 %v837_v52, %v805_v27 }
 0x1b4   : > { %v1344_v33 = vpop.eup %1343  ;;  %v838_v55 = vmul.f32 %v806_v50, %v806_v50  ;;  %1353 = vrsqrt.f32 %v718_v26  ;;  %v719_v34 = vmax.f32 %v684_v38, 1e-24 }
 0x1b5   : > { %v899_v59 = vadd.f32 %v898_v22, %v868_v51  ;;  %v839_v61 = vmul.f32 %v807_v54, %v807_v54  ;;  %v808_v35 = vmax.f32 %v776_v56, 1e-06  ;;  %v777_v46 = vmul.f32 %v1344_v33, %v1632_v7  ;;  %v686_v63 = vpop.xlane.xlu1 %685 }
 0x1b6   : > { %v1346_v0 = vpop.eup %1345  ;;  %1355 = vrsqrt.f32 %v719_v34  ;;  %v720_v4 = vmax.f32 %v686_v63, 1e-24  ;;  %v870_v32 = vmul.f32 %v838_v55, %v806_v50 }
 0x1b7   : > { %v900_v2 = vadd.f32 %v899_v59, %v869_v62  ;;  %v840_v3 = vmul.f32 %v808_v35, %v808_v35  ;;  %v809_v5 = vmax.f32 %v777_v46, 1e-06  ;;  %v688_v60 = vpop.xlane.xlu0 %687  ;;  %v778_v58 = vmul.f32 %v1346_v0, %v1637_v12 }
 0x1b8   : > { %v1348_v6 = vpop.eup %1347  ;;  %1357 = vrsqrt.f32 %v720_v4  ;;  %v721_v10 = vmax.f32 %v688_v60, 1e-24  ;;  %v871_v9 = vmul.f32 %v839_v61, %v807_v54 }
 0x1b9   : > { %v901_v13 = vadd.f32 %v900_v2, %v870_v32  ;;  %v841_v16 = vmul.f32 %v809_v5, %v809_v5  ;;  %v779_v49 = vmul.f32 %v1348_v6, %v1639_v1  ;;  %v690_v7 = vpop.xlane.xlu1 %689  ;;  %v810_v17 = vmax.f32 %v778_v58, 1e-06 }
 0x1ba   : > { %v1350_v39 = vpop.eup %1349  ;;  %1359 = vrsqrt.f32 %v721_v10  ;;  %v722_v18 = vmax.f32 %v690_v7, 1e-24  ;;  %v872_v20 = vmul.f32 %v840_v3, %v808_v35  ;;  %v1363_v7 = vld [vmem:[%s1771_s3] sm:$0xff] (!%p1140_p4)  }
 0x1bb   : > { %v902_v19 = vadd.f32 %v901_v13, %v871_v9  ;;  %v811_v14 = vmax.f32 %v779_v49, 1e-06  ;;  %v780_v40 = vmul.f32 %v1350_v39, %v1642_v15  ;;  %v873_v24 = vmul.f32 %v841_v16, %v809_v5 }
 0x1bc   : > { %v1352_v8 = vpop.eup %1351  ;;  %v842_v12 = vmul.f32 %v810_v17, %v810_v17  ;;  %1361 = vrsqrt.f32 %v722_v18  ;;  %v1416_v39 = vmov (!%p1140_p4), 0.0   ;;  %v1365_v18 = vld [vmem:[%s1771_s3 + $0x10] sm:$0xff] (!%p1140_p4)  }
 0x1bd   : > { %v903_v30 = vadd.f32 %v902_v19, %v872_v20  ;;  %v843_v36 = vmul.f32 %v811_v14, %v811_v14  ;;  %v812_v53 = vmax.f32 %v780_v40, 1e-06  ;;  %v781_v37 = vmul.f32 %v1352_v8, %v1652_v23  ;;  %1221 = vmatprep.subr.bf16.mxu0 (!%p1140_p4), %v1416_v39  ;;  %1237 = vmatprep.mubr.msk.bf16.mxu0 (!%p1140_p4), %vm1417_vm3, %v1416_v39  ;;  %v1367_v40 = vld [vmem:[%s1771_s3 + $0x20] sm:$0xff] (!%p1140_p4)   ;;  %v1368_v8 = vld [vmem:[%s1771_s3 + $0x28] sm:$0xff] (!%p1140_p4)  }
 0x1be   : > { %v1354_v1 = vpop.eup %1353  ;;  %v874_v45 = vmul.f32 %v842_v12, %v810_v17  ;;  %1222 = vmatpush3.bf16.msra.mxu0 (!%p1140_p4), %v1363_v7  ;;  %v1364_v17 = vld [vmem:[%s1771_s3 + $0x8] sm:$0xff] (!%p1140_p4)   ;;  %v1369_v12 = vld [vmem:[%s1771_s3 + $0x30] sm:$0xff] (!%p1140_p4)  }
 0x1bf   : > { %v904_v27 = vadd.f32 %v903_v30, %v873_v24  ;;  %v844_v41 = vmul.f32 %v812_v53, %v812_v53  ;;  %v813_v28 = vmax.f32 %v781_v37, 1e-06  ;;  %v782_v11 = vmul.f32 %v1354_v1, %v1657_v25  ;;  %1223 = vmatprep.subr.bf16.mxu0 (!%p1140_p4), %v1416_v39 }
 0x1c0   : > { %v1356_v42 = vpop.eup %1355  ;;  %v875_v52 = vmul.f32 %v843_v36, %v811_v14  ;;  %v1366_v14 = vld [vmem:[%s1771_s3 + $0x18] sm:$0xff] (!%p1140_p4)  }
 0x1c1   : > { %v905_v31 = vadd.f32 %v904_v27, %v874_v45  ;;  %v845_v15 = vmul.f32 %v813_v28, %v813_v28  ;;  %v783_v47 = vmul.f32 %v1356_v42, %v1659_v21  ;;  %v814_v48 = vmax.f32 %v782_v11, 1e-06  ;;  %v1370_v36 = vld [vmem:[%s1771_s3 + $0x38] sm:$0xff] (!%p1140_p4)  }
 0x1c2   : > { %v1358_v57 = vpop.eup %1357  ;;  %v876_v26 = vmul.f32 %v844_v41, %v812_v53  ;;  %1224 = vmatpush3.bf16.msra.mxu0 (!%p1140_p4), %v1364_v17 }
 0x1c3   : > { %v906_v50 = vadd.f32 %v905_v31, %v875_v52  ;;  %v815_v22 = vmax.f32 %v783_v47, 1e-06  ;;  %v784_v23 = vmul.f32 %v1358_v57, %v1662_v29  ;;  %v877_v54 = vmul.f32 %v845_v15, %v813_v28  ;;  %1225 = vmatprep.subr.bf16.mxu0 (!%p1140_p4), %v1416_v39  ;;  %v1141_v31 = vld [vmem:[%s1772_s4] ss:$0 sm:$0xff] (!%p1140_p4) }
 0x1c4   : > { %v1360_v51 = vpop.eup %1359  ;;  %v846_v56 = vmul.f32 %v814_v48, %v814_v48 }
 0x1c5   : > { %v907_v38 = vadd.f32 %v906_v50, %v876_v26  ;;  %v847_v33 = vmul.f32 %v815_v22, %v815_v22  ;;  %v816_v62 = vmax.f32 %v784_v23, 1e-06  ;;  %v785_v25 = vmul.f32 %v1360_v51, %v1671_v43 }
 0x1c6   : > { %v1362_v55 = vpop.eup %1361  ;;  %v878_v59 = vmul.f32 %v846_v56, %v814_v48  ;;  %1226 = vmatpush3.bf16.msra.mxu0 (!%p1140_p4), %v1365_v18 }
 0x1c7   : > { %v908_v34 = vadd.f32 %v907_v38, %v877_v54  ;;  %v848_v61 = vmul.f32 %v816_v62, %v816_v62  ;;  %v817_v21 = vmax.f32 %v785_v25, 1e-06  ;;  %v786_v35 = vmul.f32 %v1362_v55, %v1675_v44  ;;  %1227 = vmatprep.subr.bf16.mxu0 (!%p1140_p4), %v1416_v39 }
 0x1c8   : > { %v879_v63 = vmul.f32 %v847_v33, %v815_v22 }
 0x1c9   : > { %v909_v46 = vadd.f32 %v908_v34, %v878_v59  ;;  %v849_v0 = vmul.f32 %v817_v21, %v817_v21  ;;  %v818_v4 = vmax.f32 %v786_v35, 1e-06  ;;  %v880_v2 = vmul.f32 %v848_v61, %v816_v62 }
 0x1ca   : > { %1228 = vmatpush3.bf16.msra.mxu0 (!%p1140_p4), %v1366_v14 }
 0x1cb   : > { %v910_v29 = vadd.f32 %v909_v46, %v879_v63  ;;  %v850_v32 = vmul.f32 %v818_v4, %v818_v4  ;;  %v881_v5 = vmul.f32 %v849_v0, %v817_v21  ;;  %1229 = vmatprep.subr.bf16.mxu0 (!%p1140_p4), %v1416_v39 }
 0x1cd   : > { %v911_v3 = vadd.f32 %v910_v29, %v880_v2  ;;  %v882_v6 = vmul.f32 %v850_v32, %v818_v4 }
 0x1ce   : > { %1230 = vmatpush3.bf16.msra.mxu0 (!%p1140_p4), %v1367_v40 }
 0x1cf   : > { %v912_v60 = vadd.f32 %v911_v3, %v881_v5  ;;  %1231 = vmatprep.subr.bf16.mxu0 (!%p1140_p4), %v1416_v39 }
 0x1d1   : > { %v913_v43 = vadd.f32 %v912_v60, %v882_v6 }
 0x1d2   : > { %1232 = vmatpush3.bf16.msra.mxu0 (!%p1140_p4), %v1368_v8 }
 0x1d3   : > { %v914_v58 = vrot.slane %v913_v43, 4  ;;  %1233 = vmatprep.subr.bf16.mxu0 (!%p1140_p4), %v1416_v39 }
 0x1d5   : > { %v915_v10 = vadd.f32 %v914_v58, %v913_v43 }
 0x1d6   : > { %1234 = vmatpush3.bf16.msra.mxu0 (!%p1140_p4), %v1369_v12 }
 0x1d7   : > { %v916_v13 = vrot.slane %v915_v10, 2  ;;  %1235 = vmatprep.subr.bf16.mxu0 (!%p1140_p4), %v1416_v39 }
 0x1d9   : > { %v917_v9 = vadd.f32 %v916_v13, %v915_v10 }
 0x1da   : > { %1236 = vmatpush3.bf16.msra.mxu0 (!%p1140_p4), %v1370_v36 }
 0x1db   : > { %v918_v16 = vrot.slane %v917_v9, 1  ;;  %927 = sbr.rel (%p1140_p4) target bundleno = 899 (0x383), region = 44 }
 0x1dd   : > { %v919_v49 = vadd.f32 %v918_v16, %v917_v9 }
 0x1df   : > { %v921_v44 = vmul.f32 0.00390625, %v919_v49 }
 0x1e1   : > { %1157 = vst [vmem:[%s1155_s6 - $0x1] sm:$0x1] %v921_v44 }
 0x1e8   : > { %v928_v19 = vld [vmem:[#allocation2] sm:$0x3] }
 0x1e9   : > { %v1247_v20 = vand.u32 2147483647, %v928_v19  ;;  %v1251_v53 = vand.u32 2147483648, %v928_v19  ;;  %vm1246_vm6 = vcmp.lt.f32.partialorder %v928_v19, 0.0  ;;  %vm1245_vm7 = vcmp.eq.f32.partialorder %v928_v19, 0.0 }
 0x1eb   : > { %1371 = vlog2.f32 %v1247_v20  ;;  %vm1255_vm4 = vweird.f32 %v1247_v20  ;;  %vm1257_vm5 = vcmp.eq.f32.partialorder %v1247_v20, 0.0  ;;  %vm1248_vm8 = vcmp.eq.f32.partialorder %v1247_v20, inf }
 0x1f5   : > { %v1372_v24 = vpop.eup %1371 }
 0x1f6   : > { %v1252_v30 = vmul.f32 0.33333334, %v1372_v24 }
 0x1f8   : > { %1373 = vpow2.f32 %v1252_v30 }
 0x202   : > { %v1374_v37 = vpop.eup %1373 }
 0x203   : > { %v1254_v1 = vor.u32 %v1374_v37, %v1251_v53 }
 0x205   : > { %v1256_v27 = vsel %vm1255_vm4, %v928_v19, %v1254_v1 }
 0x206   : > { %v1259_v45 = vsel %vm1257_vm5, %v1251_v53, %v1256_v27 }
 0x207   : > { %v1260_v41 = vsel %vm1246_vm6, nan, %v1259_v45 }
 0x208   : > { %v1261_v28 = vsel %vm1245_vm7, 0.0, %v1260_v41 }
 0x209   : > { %v1262_v42 = vsel %vm1248_vm8, inf, %v1261_v28 }
 0x20a   : > { %v930_v11 = vpack.c.bf16 %v1262_v42, %v1262_v42 }
 0x20c   : > { %1238 = vmatmul.mubr.bf16.vlgmr.msra.gmra.mrb[0].mxu0 %v930_v11 }
 0x2df   : > { %v1036_v52 = vpop.f32.mrb[0].mxu0 }
 0x2e0   : > { %v1037_v15 = vadd.f32 %v1141_v31, %v1036_v52  ;;  %v1239_v47 = vpop.f32.mrb[1].mxu0 }
 0x2e1   : > { %v1039_v57 = vpop.f32.mrb[2].mxu0 }
 0x2e2   : > { %v1240_v48 = vpop.f32.mrb[3].mxu0  ;;  %v1042_v50 = vmul.f32 %v1037_v15, %v1037_v15 }
 0x2e4   : > { %v1044_v26 = vsel %vm1043_vm9, %v1042_v50, 0.0 }
 0x2e5   : > { %1045 = vadd.xlane.f32.xlu0 %v1044_v26 }
 0x372   : > { %v1046_v22 = vpop.xlane.xlu0 %1045 }
 0x373   : > { %v1047_v23 = vmax.f32 %v1046_v22, 1e-24 }
 0x375   : > { %1375 = vrsqrt.f32 %v1047_v23 }
 0x37f   : > { %v1376_v51 = vpop.eup %1375 }
 0x380   : > { %v1049_v54 = vmul.f32 %v1376_v51, %v1037_v15 }
 0x382   : > { %1050 = vst [vmem:[#allocation3] sm:$0x3] %v1049_v54 }
 0x383 PF: > { %p1267_p5 = scmp.eq.s32.totalorder %s1455_s19, 1  ;;  %s1418_s27 = smov [#allocation3]  }
 0x384   : > { %s1058_s28 = sshll.u32 %s1418_s27, 4  ;;  %s1059_s28 = int_to_ptr.vmem [resolvable:$true] %s1058_s28 }
 0x385   : > { %s1377_s29 = scalar_lea.vmem %s1059_s28, 32  ;;  %p1384_p9 = scmp.lt.s32.totalorder %s1059_s28, %s1059_s28 }
 0x386   : > { %p1378_p6 = scmp.ne.s32.totalorder %s1059_s28, %s1377_s29  ;;  %p1385_p10 = scmp.lt.s32.totalorder %s1377_s29, %s1377_s29 }
 0x388   : > { %p1379_p7 = pnand %p1378_p6, %p1267_p5  ;;  %p1386_p11 = por %p1385_p10, %p1384_p9 }
 0x38a   : > { %p1380_p8 = pneg %p1379_p7 }
 0x38c   : > { %p1387_p12 = pnand %p1386_p11, %p1380_p8 }
 0x38e   : > { %1390 = shalt.err (!%p1387_p12)
}
 0x38f   : > { %s1391_s7 = scalar_lea.hbm %s1773_s5, 32 }
 0x390   : > { %p1392_p13 = scmp.ne.s32.totalorder %s1773_s5, %s1391_s7  ;;  %p1397_p2 = scmp.lt.u32.totalorder %s1391_s7, %s1773_s5 }
 0x392   : > { %p1393_p0 = pnand %p1392_p13, %p1267_p5 }
 0x394   : > { %p1394_p1 = pneg %p1393_p0 }
 0x396   : > { %p1399_p3 = pnand %p1397_p2, %p1394_p1 }
 0x398   : > { %1402 = shalt.err (!%p1399_p3)
}
 0x399   : > { %1264 = dma.vmem_to_hbm [thread:$0]  (%p1267_p5), %s1059_s28, 32, %s1773_s5, [#allocation4]  }
 0x39a   : > { %1408 = dma.done.wait (%p1267_p5), [#allocation4], 32  }
 0x39b   : > { %1410 = vsyncadd (%p1267_p5), [#allocation4], 4294967264 }
 0x39c PF: > { %s16_s18 = sadd.s32 1, %s1413_s18  }
 0x39d   : > { %p13_p4 = scmp.ge.s32.totalorder %s16_s18, 4  }
 0x39f   :  { %15 = sbr.rel (!%p13_p4) target bundleno = 1 (0x1), region = 72 }
 0x3a6   :  { %1071 = vsyncpa [#allocation4], 1 }
 0x3a7   :  { %1073 = vsyncpa [#allocation4 + $0x1], 1 }

</bundles_post_ra>
